<compile_context>
chip_gen: v5e
topology: v5e:2x2
jax: 0.10.0
libtpu: 0.0.40
codegen_flags: <defaults>
</compile_context>

<pallas_src>
import functools

import jax
import jax.numpy as jnp
from jax.experimental import pallas as pl
from jax.experimental.pallas import tpu as pltpu

LANE = 128
SUBLANE = 8


def _round_up(x, m):
    return ((x + m - 1) // m) * m


def _vmem_limit(*block_bytes):
    # Pipelined blocks are double-buffered; add headroom, clamp to the smallest
    # physical VMEM (v7x: 64 MiB per TensorCore).
    need = 2 * sum(int(b) for b in block_bytes) + (4 << 20)
    return int(min(max(need, 16 << 20), 64 << 20))


# ---------------------------------------------------------------------------
# Kernels
# ---------------------------------------------------------------------------
def _fused_encoder_kernel(x_ref, a_ref, p_ref, w0_ref, b0_ref, w1_ref, b1_ref,
                          w2_ref, b2_ref, o_ref, h_sc):
    """Entire forward, everything VMEM-resident (small/medium graphs)."""
    f32, bf16 = jnp.float32, jnp.bfloat16
    # node_lin: relu(X @ W0 + b0)
    h = jnp.dot(x_ref[...], w0_ref[...], preferred_element_type=f32) + b0_ref[...]
    h_sc[...] = jnp.maximum(h, 0.0).astype(bf16)
    # Layer_1: relu((Ahat @ h) @ W1 + b1)
    t = jnp.dot(a_ref[...], h_sc[...], preferred_element_type=f32).astype(bf16)
    h = jnp.dot(t, w1_ref[...], preferred_element_type=f32) + b1_ref[...]
    h_sc[...] = jnp.maximum(h, 0.0).astype(bf16)
    # Layer_2: relu((Ahat @ h) @ W2 + b2)
    t = jnp.dot(a_ref[...], h_sc[...], preferred_element_type=f32).astype(bf16)
    h = jnp.dot(t, w2_ref[...], preferred_element_type=f32) + b2_ref[...]
    h_sc[...] = jnp.maximum(h, 0.0).astype(bf16)
    # global_add_pool: P @ h
    o_ref[...] = jnp.dot(p_ref[...], h_sc[...], preferred_element_type=f32)


def _linear_relu_kernel(x_ref, w_ref, b_ref, o_ref):
    # relu(X @ W + b): f32 accumulation, bias/ReLU in f32, bf16 store.
    acc = jnp.dot(x_ref[...], w_ref[...], preferred_element_type=jnp.float32)
    o_ref[...] = jnp.maximum(acc + b_ref[...], 0.0).astype(o_ref.dtype)


def _gcn_layer_kernel(a_ref, h_ref, w_ref, b_ref, o_ref, acc_ref):
    # relu((Ahat @ H) @ W + b): Ahat contraction over the trailing grid axis,
    # feature transform + bias + ReLU fused into the finalize step.
    @pl.when(pl.program_id(1) == 0)
    def _():
        acc_ref[...] = jnp.zeros_like(acc_ref)

    acc_ref[...] += jnp.dot(
        a_ref[...], h_ref[...], preferred_element_type=jnp.float32
    )

    @pl.when(pl.program_id(1) == pl.num_programs(1) - 1)
    def _():
        t = acc_ref[...].astype(jnp.bfloat16)
        out = jnp.dot(t, w_ref[...], preferred_element_type=jnp.float32) + b_ref[...]
        o_ref[...] = jnp.maximum(out, 0.0).astype(o_ref.dtype)


def _pool_kernel(p_ref, h_ref, o_ref, acc_ref):
    # global_add_pool: P @ H accumulated over node-column blocks.
    @pl.when(pl.program_id(0) == 0)
    def _():
        acc_ref[...] = jnp.zeros_like(acc_ref)

    acc_ref[...] += jnp.dot(
        p_ref[...], h_ref[...], preferred_element_type=jnp.float32
    )

    @pl.when(pl.program_id(0) == pl.num_programs(0) - 1)
    def _():
        o_ref[...] = acc_ref[...]


# ---------------------------------------------------------------------------
# pallas_call wrappers
# ---------------------------------------------------------------------------
def _fused_forward(xp, ap, pp, w0p, b0p, w1p, b1p, w2p, b2p):
    n_pad, din_p = xp.shape
    d_p = w0p.shape[1]
    g_p = pp.shape[0]
    est = (xp.size * 2 + ap.size * 2 + pp.size * 2
           + (w0p.size + w1p.size + w2p.size) * 2 + 3 * d_p * 4
           + g_p * d_p * 4 + n_pad * d_p * 2 + 2 * n_pad * d_p * 4)
    cp = pltpu.CompilerParams(vmem_limit_bytes=int(min(2 * est + (8 << 20), 64 << 20)))
    flops = (2 * n_pad * din_p * d_p
             + 2 * (2 * n_pad * n_pad * d_p + 2 * n_pad * d_p * d_p)
             + 2 * g_p * n_pad * d_p)
    cost = pl.CostEstimate(
        flops=int(flops), transcendentals=0,
        bytes_accessed=int(xp.size * 2 + ap.size * 2 + pp.size * 2
                           + (w0p.size + w1p.size + w2p.size) * 2
                           + 3 * d_p * 4 + g_p * d_p * 4))
    return pl.pallas_call(
        _fused_encoder_kernel,
        out_shape=jax.ShapeDtypeStruct((g_p, d_p), jnp.float32),
        scratch_shapes=[pltpu.VMEM((n_pad, d_p), jnp.bfloat16)],
        compiler_params=cp,
        cost_estimate=cost,
    )(xp, ap, pp, w0p, b0p, w1p, b1p, w2p, b2p)


def _row_tiled_linear_relu(x, w, b, *, tm):
    n, kdim = x.shape
    d = w.shape[1]
    block_bytes = (tm * kdim * 2, kdim * d * 2, d * 4, tm * d * 2)
    cp = pltpu.CompilerParams(
        dimension_semantics=("parallel",),
        vmem_limit_bytes=_vmem_limit(*block_bytes),
    )
    cost = pl.CostEstimate(
        flops=2 * n * kdim * d, transcendentals=0,
        bytes_accessed=x.size * 2 + w.size * 2 + b.size * 4 + n * d * 2)
    return pl.pallas_call(
        _linear_relu_kernel,
        out_shape=jax.ShapeDtypeStruct((n, d), jnp.bfloat16),
        grid=(n // tm,),
        in_specs=[
            pl.BlockSpec((tm, kdim), lambda i: (i, 0)),
            pl.BlockSpec((kdim, d), lambda i: (0, 0)),   # resident weights
            pl.BlockSpec((1, d), lambda i: (0, 0)),      # resident bias
        ],
        out_specs=pl.BlockSpec((tm, d), lambda i: (i, 0)),
        compiler_params=cp,
        cost_estimate=cost,
    )(x, w, b)


def _gcn_layer(a, h, w, b, *, tm, tk):
    n = a.shape[0]
    d = h.shape[1]
    block_bytes = (tm * tk * 2, tk * d * 2, d * d * 2, d * 4, tm * d * 2, tm * d * 4)
    cp = pltpu.CompilerParams(
        dimension_semantics=("parallel", "arbitrary"),
        vmem_limit_bytes=_vmem_limit(*block_bytes),
    )
    cost = pl.CostEstimate(
        flops=2 * n * n * d + 2 * n * d * d, transcendentals=0,
        bytes_accessed=a.size * 2 + (n // tm) * h.size * 2 + w.size * 2
        + b.size * 4 + n * d * 2)
    return pl.pallas_call(
        _gcn_layer_kernel,
        out_shape=jax.ShapeDtypeStruct((n, d), jnp.bfloat16),
        grid=(n // tm, n // tk),
        in_specs=[
            pl.BlockSpec((tm, tk), lambda i, k: (i, k)),
            pl.BlockSpec((tk, d), lambda i, k: (k, 0)),
            pl.BlockSpec((d, d), lambda i, k: (0, 0)),   # resident weights
            pl.BlockSpec((1, d), lambda i, k: (0, 0)),   # resident bias
        ],
        out_specs=pl.BlockSpec((tm, d), lambda i, k: (i, 0)),
        scratch_shapes=[pltpu.VMEM((tm, d), jnp.float32)],
        compiler_params=cp,
        cost_estimate=cost,
    )(a, h, w, b)


def _pool_matmul(p, h, *, tk):
    g = p.shape[0]
    n, d = h.shape
    block_bytes = (g * tk * 2, tk * d * 2, g * d * 4, g * d * 4)
    cp = pltpu.CompilerParams(
        dimension_semantics=("arbitrary",),
        vmem_limit_bytes=_vmem_limit(*block_bytes),
    )
    cost = pl.CostEstimate(
        flops=2 * g * n * d, transcendentals=0,
        bytes_accessed=p.size * 2 + h.size * 2 + g * d * 4)
    return pl.pallas_call(
        _pool_kernel,
        out_shape=jax.ShapeDtypeStruct((g, d), jnp.float32),
        grid=(n // tk,),
        in_specs=[
            pl.BlockSpec((g, tk), lambda k: (0, k)),
            pl.BlockSpec((tk, d), lambda k: (k, 0)),
        ],
        out_specs=pl.BlockSpec((g, d), lambda k: (0, 0)),
        scratch_shapes=[pltpu.VMEM((g, d), jnp.float32)],
        compiler_params=cp,
        cost_estimate=cost,
    )(p, h)


# ---------------------------------------------------------------------------
# Full GNNEncoder forward (padding + dispatch fused / tiled)
# ---------------------------------------------------------------------------
@functools.partial(jax.jit, static_argnames=("force_tiled",))
def gnn_encoder_pallas(x, ahat, pool, params, force_tiled=False):
    (w0, b0), (w1, b1), (w2, b2) = params
    n, din = x.shape
    g = pool.shape[0]
    d = w0.shape[1]

    # Padded, lane/sublane-aligned shapes. Zero padding is exact: padded Ahat
    # rows/cols and padded pool cols are zero, so padded nodes never contribute
    # to real outputs; padded feature cols stay exactly zero.
    if n <= 128:
        n_pad = 128
    else:
        n_pad = _round_up(n, 256)          # 256-aligned row/col tiles for the MXU
    tm = tk = min(256, n_pad)
    din_p = _round_up(din, LANE)
    d_p = _round_up(d, LANE)
    g_p = _round_up(g, SUBLANE)

    def pad2(arr, rows, cols, dtype):
        out = jnp.zeros((rows, cols), dtype)
        return out.at[: arr.shape[0], : arr.shape[1]].set(arr.astype(dtype))

    bf16, f32 = jnp.bfloat16, jnp.float32
    xp = pad2(x, n_pad, din_p, bf16)
    ap = pad2(ahat, n_pad, n_pad, bf16)
    pp = pad2(pool, g_p, n_pad, bf16)
    w0p, b0p = pad2(w0, din_p, d_p, bf16), pad2(b0, 1, d_p, f32)
    w1p, b1p = pad2(w1, d_p, d_p, bf16), pad2(b1, 1, d_p, f32)
    w2p, b2p = pad2(w2, d_p, d_p, bf16), pad2(b2, 1, d_p, f32)

    # Estimated VMEM footprint of the fully fused path.
    fused_bytes = (xp.size * 2 + ap.size * 2 + pp.size * 2
                   + (w0p.size + w1p.size + w2p.size) * 2 + 3 * d_p * 4
                   + g_p * d_p * 4 + n_pad * d_p * 2 + 2 * n_pad * d_p * 4)

    if (not force_tiled) and fused_bytes <= (24 << 20):
        # One launch: everything resident in VMEM, no intermediate HBM traffic.
        out = _fused_forward(xp, ap, pp, w0p, b0p, w1p, b1p, w2p, b2p)
    else:
        # Tiled path for large graphs (4 launches, per-layer fused GCN kernel).
        h = _row_tiled_linear_relu(xp, w0p, b0p, tm=tm)        # node_lin
        h = _gcn_layer(ap, h, w1p, b1p, tm=tm, tk=tk)          # Layer_1
        h = _gcn_layer(ap, h, w2p, b2p, tm=tm, tk=tk)          # Layer_2
        out = _pool_matmul(pp, h, tk=tk)                       # global_add_pool
    return out[:g, :d]


# ---------------------------------------------------------------------------
# Glue: dense normalized adjacency + pooling matrix, params, reference.
# ---------------------------------------------------------------------------
def build_gcn_adjacency(edge_index, num_nodes):
    src, dst = edge_index
    a = jnp.zeros((num_nodes, num_nodes), jnp.float32)
    a = a.at[dst, src].add(1.0)                    # message src -> dst
    a = a.at[src, dst].add(1.0)                    # symmetrize (undirected)
    a = jnp.minimum(a, 1.0)                        # de-duplicate parallel edges
    a = a + jnp.eye(num_nodes, dtype=jnp.float32)  # self-loops
    deg = a.sum(axis=1)
    dinv = jnp.where(deg > 0, 1.0 / jnp.sqrt(deg), 0.0)
    return dinv[:, None] * a * dinv[None, :]       # D^-1/2 (A+I) D^-1/2


def build_pool_matrix(batch, num_graphs):
    return (batch[None, :] == jnp.arange(num_graphs)[:, None]).astype(jnp.float32)


def init_params(key, dim_in, dim_inner):
    ks = jax.random.split(key, 3)

    def linear(k, fan_in, fan_out):
        scale = 1.0 / jnp.sqrt(jnp.float32(fan_in))
        w = jax.random.uniform(k, (fan_in, fan_out), jnp.float32, -scale, scale)
        b = jnp.zeros((1, fan_out), jnp.float32)
        return w, b

    return [linear(ks[0], dim_in, dim_inner),
            linear(ks[1], dim_inner, dim_inner),
            linear(ks[2], dim_inner, dim_inner)]


def reference_forward(x, ahat, pool, params):
    # Mirrors the kernels' cast points (bf16 matmul operands, f32 accumulation)
    # and the reassociated GCN order (Ahat @ h) @ W, which equals the original
    # Ahat @ (h @ W) exactly in real arithmetic.
    (w0, b0), (w1, b1), (w2, b2) = params
    bf = jnp.bfloat16

    def mm(a, b):
        return jnp.dot(a.astype(bf), b.astype(bf), preferred_element_type=jnp.float32)

    h = jnp.maximum(mm(x, w0) + b0, 0.0)
    h = jnp.maximum(mm(mm(ahat, h), w1) + b1, 0.0)
    h = jnp.maximum(mm(mm(ahat, h), w2) + b2, 0.0)
    return mm(pool, h)


if __name__ == "__main__":
    key = jax.random.PRNGKey(0)
    k_x, k_e, k_p = jax.random.split(key, 3)

    N, dim_in, dim_inner = 16, 8, 32
    num_graphs, num_edges = 2, 24

    x = jax.random.normal(k_x, (N, dim_in), jnp.float32)
    edge_index = jax.random.randint(k_e, (2, num_edges), 0, N)
    batch = jnp.concatenate([jnp.zeros(N // 2, jnp.int32),
                             jnp.ones(N - N // 2, jnp.int32)])

    ahat = build_gcn_adjacency(edge_index, N)
    pool = build_pool_matrix(batch, num_graphs)
    params = init_params(k_p, dim_in, dim_inner)

    ref = reference_forward(x, ahat, pool, params)

    # Fused single-kernel fast path.
    out = jax.block_until_ready(gnn_encoder_pallas(x, ahat, pool, params))
    assert out.shape == (num_graphs, dim_inner)
    assert jnp.allclose(out, ref, atol=2e-2, rtol=2e-2), "fused path mismatch vs reference"

    # Tiled fallback path (exercised explicitly so both code paths are verified).
    out_tiled = jax.block_until_ready(
        gnn_encoder_pallas(x, ahat, pool, params, force_tiled=True))
    assert out_tiled.shape == (num_graphs, dim_inner)
    assert jnp.allclose(out_tiled, ref, atol=2e-2, rtol=2e-2), "tiled path mismatch vs reference"

    print("KERNEL_OK")
</pallas_src>

<mosaic_0001>
module attributes {stable_mosaic.version = 11 : i64} {
  func.func @_fused_encoder_kernel(%arg0: memref<128x128xbf16, #tpu.memory_space<vmem>>, %arg1: memref<128x128xbf16, #tpu.memory_space<vmem>>, %arg2: memref<8x128xbf16, #tpu.memory_space<vmem>>, %arg3: memref<128x128xbf16, #tpu.memory_space<vmem>>, %arg4: memref<1x128xf32, #tpu.memory_space<vmem>>, %arg5: memref<128x128xbf16, #tpu.memory_space<vmem>>, %arg6: memref<1x128xf32, #tpu.memory_space<vmem>>, %arg7: memref<128x128xbf16, #tpu.memory_space<vmem>>, %arg8: memref<1x128xf32, #tpu.memory_space<vmem>>, %arg9: memref<8x128xf32, #tpu.memory_space<vmem>>, %arg10: memref<128x128xbf16, #tpu.memory_space<vmem>>) attributes {dimension_semantics = [], scalar_prefetch = 0 : i64, scratch_operands = 1 : i64, tpu.core_type = #tpu.core_type<tc>} {
    %c0 = arith.constant 0 : index
    %c0_0 = arith.constant 0 : index
    %0 = vector.load %arg0[%c0, %c0_0] : memref<128x128xbf16, #tpu.memory_space<vmem>>, vector<128x128xbf16>
    %c0_1 = arith.constant 0 : index
    %c0_2 = arith.constant 0 : index
    %1 = vector.load %arg3[%c0_1, %c0_2] : memref<128x128xbf16, #tpu.memory_space<vmem>>, vector<128x128xbf16>
    %cst = arith.constant dense<0.000000e+00> : vector<128x128xf32>
    %2 = tpu.matmul %0, %1, %cst {dimension_numbers = #tpu.dot_dimension_numbers<[1], [0], [0], [1], [0, 0, 1, 1], [], []>} : vector<128x128xbf16>, vector<128x128xbf16>, vector<128x128xf32> -> vector<128x128xf32>
    %c0_3 = arith.constant 0 : index
    %c0_4 = arith.constant 0 : index
    %3 = vector.load %arg4[%c0_3, %c0_4] : memref<1x128xf32, #tpu.memory_space<vmem>>, vector<1x128xf32>
    %4 = vector.broadcast %3 : vector<1x128xf32> to vector<128x128xf32>
    %5 = arith.addf %2, %4 : vector<128x128xf32>
    %cst_5 = arith.constant 0.000000e+00 : f32
    %6 = vector.broadcast %cst_5 : f32 to vector<128x128xf32>
    %7 = arith.maximumf %5, %6 : vector<128x128xf32>
    %8 = arith.truncf %7 : vector<128x128xf32> to vector<128x128xbf16>
    %c0_6 = arith.constant 0 : index
    %c0_7 = arith.constant 0 : index
    %9 = vector.load %arg10[%c0_6, %c0_7] : memref<128x128xbf16, #tpu.memory_space<vmem>>, vector<128x128xbf16>
    tpu.vector_store %arg10[%c0_6, %c0_7], %8 {strides = array<i32>} : memref<128x128xbf16, #tpu.memory_space<vmem>>, vector<128x128xbf16>,
    %c0_8 = arith.constant 0 : index
    %c0_9 = arith.constant 0 : index
    %10 = vector.load %arg1[%c0_8, %c0_9] : memref<128x128xbf16, #tpu.memory_space<vmem>>, vector<128x128xbf16>
    %c0_10 = arith.constant 0 : index
    %c0_11 = arith.constant 0 : index
    %11 = vector.load %arg10[%c0_10, %c0_11] : memref<128x128xbf16, #tpu.memory_space<vmem>>, vector<128x128xbf16>
    %cst_12 = arith.constant dense<0.000000e+00> : vector<128x128xf32>
    %12 = tpu.matmul %10, %11, %cst_12 {dimension_numbers = #tpu.dot_dimension_numbers<[1], [0], [0], [1], [0, 0, 1, 1], [], []>} : vector<128x128xbf16>, vector<128x128xbf16>, vector<128x128xf32> -> vector<128x128xf32>
    %13 = arith.truncf %12 : vector<128x128xf32> to vector<128x128xbf16>
    %c0_13 = arith.constant 0 : index
    %c0_14 = arith.constant 0 : index
    %14 = vector.load %arg5[%c0_13, %c0_14] : memref<128x128xbf16, #tpu.memory_space<vmem>>, vector<128x128xbf16>
    %cst_15 = arith.constant dense<0.000000e+00> : vector<128x128xf32>
    %15 = tpu.matmul %13, %14, %cst_15 {dimension_numbers = #tpu.dot_dimension_numbers<[1], [0], [0], [1], [0, 0, 1, 1], [], []>} : vector<128x128xbf16>, vector<128x128xbf16>, vector<128x128xf32> -> vector<128x128xf32>
    %c0_16 = arith.constant 0 : index
    %c0_17 = arith.constant 0 : index
    %16 = vector.load %arg6[%c0_16, %c0_17] : memref<1x128xf32, #tpu.memory_space<vmem>>, vector<1x128xf32>
    %17 = vector.broadcast %16 : vector<1x128xf32> to vector<128x128xf32>
    %18 = arith.addf %15, %17 : vector<128x128xf32>
    %cst_18 = arith.constant 0.000000e+00 : f32
    %19 = vector.broadcast %cst_18 : f32 to vector<128x128xf32>
    %20 = arith.maximumf %18, %19 : vector<128x128xf32>
    %21 = arith.truncf %20 : vector<128x128xf32> to vector<128x128xbf16>
    %c0_19 = arith.constant 0 : index
    %c0_20 = arith.constant 0 : index
    %22 = vector.load %arg10[%c0_19, %c0_20] : memref<128x128xbf16, #tpu.memory_space<vmem>>, vector<128x128xbf16>
    tpu.vector_store %arg10[%c0_19, %c0_20], %21 {strides = array<i32>} : memref<128x128xbf16, #tpu.memory_space<vmem>>, vector<128x128xbf16>,
    %c0_21 = arith.constant 0 : index
    %c0_22 = arith.constant 0 : index
    %23 = vector.load %arg1[%c0_21, %c0_22] : memref<128x128xbf16, #tpu.memory_space<vmem>>, vector<128x128xbf16>
    %c0_23 = arith.constant 0 : index
    %c0_24 = arith.constant 0 : index
    %24 = vector.load %arg10[%c0_23, %c0_24] : memref<128x128xbf16, #tpu.memory_space<vmem>>, vector<128x128xbf16>
    %cst_25 = arith.constant dense<0.000000e+00> : vector<128x128xf32>
    %25 = tpu.matmul %23, %24, %cst_25 {dimension_numbers = #tpu.dot_dimension_numbers<[1], [0], [0], [1], [0, 0, 1, 1], [], []>} : vector<128x128xbf16>, vector<128x128xbf16>, vector<128x128xf32> -> vector<128x128xf32>
    %26 = arith.truncf %25 : vector<128x128xf32> to vector<128x128xbf16>
    %c0_26 = arith.constant 0 : index
    %c0_27 = arith.constant 0 : index
    %27 = vector.load %arg7[%c0_26, %c0_27] : memref<128x128xbf16, #tpu.memory_space<vmem>>, vector<128x128xbf16>
    %cst_28 = arith.constant dense<0.000000e+00> : vector<128x128xf32>
    %28 = tpu.matmul %26, %27, %cst_28 {dimension_numbers = #tpu.dot_dimension_numbers<[1], [0], [0], [1], [0, 0, 1, 1], [], []>} : vector<128x128xbf16>, vector<128x128xbf16>, vector<128x128xf32> -> vector<128x128xf32>
    %c0_29 = arith.constant 0 : index
    %c0_30 = arith.constant 0 : index
    %29 = vector.load %arg8[%c0_29, %c0_30] : memref<1x128xf32, #tpu.memory_space<vmem>>, vector<1x128xf32>
    %30 = vector.broadcast %29 : vector<1x128xf32> to vector<128x128xf32>
    %31 = arith.addf %28, %30 : vector<128x128xf32>
    %cst_31 = arith.constant 0.000000e+00 : f32
    %32 = vector.broadcast %cst_31 : f32 to vector<128x128xf32>
    %33 = arith.maximumf %31, %32 : vector<128x128xf32>
    %34 = arith.truncf %33 : vector<128x128xf32> to vector<128x128xbf16>
    %c0_32 = arith.constant 0 : index
    %c0_33 = arith.constant 0 : index
    %35 = vector.load %arg10[%c0_32, %c0_33] : memref<128x128xbf16, #tpu.memory_space<vmem>>, vector<128x128xbf16>
    tpu.vector_store %arg10[%c0_32, %c0_33], %34 {strides = array<i32>} : memref<128x128xbf16, #tpu.memory_space<vmem>>, vector<128x128xbf16>,
    %c0_34 = arith.constant 0 : index
    %c0_35 = arith.constant 0 : index
    %36 = vector.load %arg2[%c0_34, %c0_35] : memref<8x128xbf16, #tpu.memory_space<vmem>>, vector<8x128xbf16>
    %c0_36 = arith.constant 0 : index
    %c0_37 = arith.constant 0 : index
    %37 = vector.load %arg10[%c0_36, %c0_37] : memref<128x128xbf16, #tpu.memory_space<vmem>>, vector<128x128xbf16>
    %cst_38 = arith.constant dense<0.000000e+00> : vector<8x128xf32>
    %38 = tpu.matmul %36, %37, %cst_38 {dimension_numbers = #tpu.dot_dimension_numbers<[1], [0], [0], [1], [0, 0, 1, 1], [], []>} : vector<8x128xbf16>, vector<128x128xbf16>, vector<8x128xf32> -> vector<8x128xf32>
    %c0_39 = arith.constant 0 : index
    %c0_40 = arith.constant 0 : index
    %39 = vector.load %arg9[%c0_39, %c0_40] : memref<8x128xf32, #tpu.memory_space<vmem>>, vector<8x128xf32>
    tpu.vector_store %arg9[%c0_39, %c0_40], %38 {strides = array<i32>} : memref<8x128xf32, #tpu.memory_space<vmem>>, vector<8x128xf32>,
    return
  }
}

</mosaic_0001>

<bundles_post_ra>
// kernel: gnn_encoder_pallas.1
= control target key start
LH: loop header
LB: loop body
LE: loop exit
PB: predicated region body
PF: predicated region fallthrough
CT: control target
= control target key end

     0   :  { %s1773_s3 = inlined_call_operand.vmem [shape: bf16[128,128], index: 3, kind: input, shape index: {}]   ;;  %s1774_s4 = inlined_call_operand.vmem [shape: f32[1,128], index: 4, kind: input, shape index: {}]   ;;  %s1775_s0 = inlined_call_operand.vmem [shape: bf16[128,128], index: 0, kind: input, shape index: {}]   ;;  %s1776_s1 = inlined_call_operand.vmem [shape: bf16[128,128], index: 1, kind: input, shape index: {}]   ;;  %s1777_s5 = inlined_call_operand.vmem [shape: bf16[128,128], index: 5, kind: input, shape index: {}]   ;;  %s1778_s6 = inlined_call_operand.vmem [shape: f32[1,128], index: 6, kind: input, shape index: {}]   ;;  %s1779_s7 = inlined_call_operand.vmem [shape: bf16[128,128], index: 7, kind: input, shape index: {}]   ;;  %s1780_s8 = inlined_call_operand.vmem [shape: f32[1,128], index: 8, kind: input, shape index: {}]   ;;  %s1781_s2 = inlined_call_operand.vmem [shape: bf16[8,128], index: 2, kind: input, shape index: {}]   ;;  %s1782_s9 = inlined_call_operand.vmem [shape: f32[8,128], index: 9, kind: output, shape index: {}]  }
   0x1   :  { %v1347_v0 = vld [vmem:[%s1773_s3 + $0x38] sm:$0xff]  ;;  %v1346_v1 = vld [vmem:[%s1773_s3 + $0x30] sm:$0xff]  ;;  %v1345_v2 = vld [vmem:[%s1773_s3 + $0x28] sm:$0xff] }
   0x2   :  { %1546 = vmatpush.bf16.msra.mxu3 %v1347_v0  ;;  %164 = vmatpush.bf16.msra.mxu0 %v1347_v0  ;;  %v1344_v3 = vld [vmem:[%s1773_s3 + $0x20] sm:$0xff]  ;;  %v1343_v4 = vld [vmem:[%s1773_s3 + $0x18] sm:$0xff]  ;;  %v1342_v5 = vld [vmem:[%s1773_s3 + $0x10] sm:$0xff] }
   0x3   :  { %1545 = vmatpush.bf16.msra.mxu2 %v1347_v0  ;;  %v1341_v6 = vld [vmem:[%s1773_s3 + $0x8] sm:$0xff]  ;;  %v1340_v7 = vld [vmem:[%s1773_s3] sm:$0xff]  ;;  %v1335_v10 = vld [vmem:[%s1775_s0 + $0x18] sm:$0xff] }
   0x4   :  { %v1337_v8 = vld [vmem:[%s1775_s0 + $0x28] sm:$0xff]  ;;  %v1332_v9 = vld [vmem:[%s1775_s0] sm:$0xff]  ;;  %v1338_v11 = vld [vmem:[%s1775_s0 + $0x30] sm:$0xff] }
   0x5   :  { %v1333_v12 = vld [vmem:[%s1775_s0 + $0x8] sm:$0xff]  ;;  %v1336_v13 = vld [vmem:[%s1775_s0 + $0x20] sm:$0xff]  ;;  %v1339_v14 = vld [vmem:[%s1775_s0 + $0x38] sm:$0xff] }
   0x6   :  { %1548 = vmatpush.bf16.msra.mxu3 %v1346_v1  ;;  %165 = vmatpush.bf16.msra.mxu0 %v1346_v1  ;;  %v1334_v15 = vld [vmem:[%s1775_s0 + $0x10] sm:$0xff]  ;;  %v1561_v17 = vld [vmem:[%s1774_s4] ss:$0 sm:$0xff] }
   0x7   :  { %1547 = vmatpush.bf16.msra.mxu2 %v1346_v1 }
   0xa   :  { %1550 = vmatpush.bf16.msra.mxu3 %v1345_v2  ;;  %166 = vmatpush.bf16.msra.mxu0 %v1345_v2 }
   0xb   :  { %1549 = vmatpush.bf16.msra.mxu2 %v1345_v2 }
   0xe   :  { %1552 = vmatpush.bf16.msra.mxu3 %v1344_v3  ;;  %167 = vmatpush.bf16.msra.mxu0 %v1344_v3 }
   0xf   :  { %1551 = vmatpush.bf16.msra.mxu2 %v1344_v3 }
  0x12   :  { %1554 = vmatpush.bf16.msra.mxu3 %v1343_v4  ;;  %168 = vmatpush.bf16.msra.mxu0 %v1343_v4 }
  0x13   :  { %1553 = vmatpush.bf16.msra.mxu2 %v1343_v4 }
  0x16   :  { %1556 = vmatpush.bf16.msra.mxu3 %v1342_v5  ;;  %169 = vmatpush.bf16.msra.mxu0 %v1342_v5 }
  0x17   :  { %1555 = vmatpush.bf16.msra.mxu2 %v1342_v5 }
  0x1a   :  { %1558 = vmatpush.bf16.msra.mxu3 %v1341_v6  ;;  %170 = vmatpush.bf16.msra.mxu0 %v1341_v6 }
  0x1b   :  { %1557 = vmatpush.bf16.msra.mxu2 %v1341_v6 }
  0x1e   :  { %1560 = vmatpush.bf16.msra.mxu3 %v1340_v7  ;;  %171 = vmatpush.bf16.msra.mxu0 %v1340_v7 }
  0x1f   :  { %1559 = vmatpush.bf16.msra.mxu2 %v1340_v7 }
  0x21   :  { %197 = vmatmul.bf16.vlgmr.msra.gmra.mxu3 %v1337_v8  ;;  %172 = vmatmul.bf16.vlgmr.msra.gmra.mxu0 %v1332_v9 }
  0x22   :  { %187 = vmatmul.bf16.vlgmr.msra.gmra.mxu2 %v1335_v10 }
  0x31   :  { %202 = vmatmul.bf16.gmra.mxu3 %v1338_v11  ;;  %177 = vmatmul.bf16.gmra.mxu0 %v1333_v12 }
  0x32   :  { %192 = vmatmul.bf16.gmra.mxu2 %v1336_v13 }
  0x41   :  { %207 = vmatmul.bf16.gmra.mxu3 %v1339_v14  ;;  %182 = vmatmul.bf16.gmra.mxu0 %v1334_v15 }
  0x9e   :  { %v173_v16 = vpop.f32.mrf.mxu0 }
  0x9f   :  { %v174_v18 = vadd.f32 %v1561_v17, %v173_v16 }
  0xa1   :  { %v213_v22 = vmax.f32 %v174_v18, 0.0  ;;  %v1349_v18 = vld [vmem:[%s1776_s1 + $0x8] sm:$0xff] }
  0xa4   :  { %v198_v19 = vpop.f32.mrf.mxu3 }
  0xa5   :  { %v188_v20 = vpop.f32.mrf.mxu2  ;;  %v199_v26 = vadd.f32 %v1561_v17, %v198_v19  ;;  %v1350_v19 = vld [vmem:[%s1776_s1 + $0x10] sm:$0xff] }
  0xa6   :  { %v175_v21 = vpop.f32.mrf.mxu0  ;;  %v189_v25 = vadd.f32 %v1561_v17, %v188_v20  ;;  %v1351_v20 = vld [vmem:[%s1776_s1 + $0x18] sm:$0xff] }
  0xa7   :  { %v176_v23 = vadd.f32 %v1561_v17, %v175_v21  ;;  %v223_v34 = vmax.f32 %v199_v26, 0.0  ;;  %v1352_v21 = vld [vmem:[%s1776_s1 + $0x20] sm:$0xff] }
  0xa8   :  { %v219_v31 = vmax.f32 %v189_v25, 0.0  ;;  %v1369_v25 = vld [vmem:[%s1777_s5 + $0x28] sm:$0xff]  ;;  %v1368_v26 = vld [vmem:[%s1777_s5 + $0x20] sm:$0xff] }
  0xa9   :  { %v214_v24 = vmax.f32 %v176_v23, 0.0  ;;  %v1370_v23 = vld [vmem:[%s1777_s5 + $0x30] sm:$0xff] }
  0xab   :  { %v1407_v27 = vpack.c.bf16 %v214_v24, %v213_v22  ;;  %v1371_v22 = vld [vmem:[%s1777_s5 + $0x38] sm:$0xff]  ;;  %v1353_v24 = vld [vmem:[%s1776_s1 + $0x28] sm:$0xff] }
  0xac   :  { %v200_v28 = vpop.f32.mrf.mxu3  ;;  %514 = vmatpush.bf16.msrb.mxu2 %v1371_v22 }
  0xad   :  { %v201_v29 = vadd.f32 %v1561_v17, %v200_v28  ;;  %1408 = vst [vmem:[#allocation2 + $0x30] sm:$0xff] %v1407_v27   ;;  %v190_v30 = vpop.f32.mrf.mxu2  ;;  %v1367_v27 = vld [vmem:[%s1777_s5 + $0x18] sm:$0xff]  ;;  %v1366_v28 = vld [vmem:[%s1777_s5 + $0x10] sm:$0xff] }
  0xae   :  { %v178_v32 = vpop.f32.mrf.mxu0  ;;  %v191_v33 = vadd.f32 %v1561_v17, %v190_v30  ;;  %v1365_v30 = vld [vmem:[%s1777_s5 + $0x8] sm:$0xff] }
  0xaf   :  { %v224_v35 = vmax.f32 %v201_v29, 0.0  ;;  %v179_v39 = vadd.f32 %v1561_v17, %v178_v32  ;;  %v1354_v29 = vld [vmem:[%s1776_s1 + $0x30] sm:$0xff]  ;;  %v1355_v32 = vld [vmem:[%s1776_s1 + $0x38] sm:$0xff] }
  0xb0   :  { %v220_v36 = vmax.f32 %v191_v33, 0.0  ;;  %515 = vmatpush.bf16.msrb.mxu2 %v1370_v23 }
  0xb1   :  { %v1432_v37 = vpack.c.bf16 %v224_v35, %v223_v34  ;;  %v215_v43 = vmax.f32 %v179_v39, 0.0 }
  0xb2   :  { %v1422_v38 = vpack.c.bf16 %v220_v36, %v219_v31  ;;  %v1364_v31 = vld [vmem:[%s1777_s5] sm:$0xff] }
  0xb3   :  { %1528 = vst [vmem:[#allocation2 + $0x20] sm:$0xff] %v1432_v37  }
  0xb4   :  { %v203_v40 = vpop.f32.mrf.mxu3  ;;  %1526 = vst [vmem:[#allocation2 + $0x10] sm:$0xff] %v1422_v38   ;;  %v1356_v16 = vld [vmem:[#allocation2 + $0x30] sm:$0xff]  ;;  %516 = vmatpush.bf16.msrb.mxu2 %v1369_v25 }
  0xb5   :  { %v193_v41 = vpop.f32.mrf.mxu2  ;;  %v204_v47 = vadd.f32 %v1561_v17, %v203_v40 }
  0xb6   :  { %v180_v42 = vpop.f32.mrf.mxu0  ;;  %v194_v46 = vadd.f32 %v1561_v17, %v193_v41 }
  0xb7   :  { %v181_v44 = vadd.f32 %v1561_v17, %v180_v42  ;;  %v225_v55 = vmax.f32 %v204_v47, 0.0 }
  0xb8   :  { %v221_v52 = vmax.f32 %v194_v46, 0.0  ;;  %517 = vmatpush.bf16.msrb.mxu2 %v1368_v26 }
  0xb9   :  { %v216_v45 = vmax.f32 %v181_v44, 0.0 }
  0xba   :  { %v1361_v11 = vld [vmem:[#allocation2 + $0x20] sm:$0xff] }
  0xbb   :  { %v1412_v48 = vpack.c.bf16 %v216_v45, %v215_v43  ;;  %v1359_v13 = vld [vmem:[#allocation2 + $0x10] sm:$0xff] }
  0xbc   :  { %v205_v49 = vpop.f32.mrf.mxu3  ;;  %518 = vmatpush.bf16.msrb.mxu2 %v1367_v27 }
  0xbd   :  { %v206_v50 = vadd.f32 %v1561_v17, %v205_v49  ;;  %1524 = vst [vmem:[#allocation2] sm:$0xff] %v1412_v48   ;;  %v195_v51 = vpop.f32.mrf.mxu2 }
  0xbe   :  { %v183_v53 = vpop.f32.mrf.mxu0  ;;  %v196_v54 = vadd.f32 %v1561_v17, %v195_v51 }
  0xbf   :  { %v226_v56 = vmax.f32 %v206_v50, 0.0  ;;  %v184_v60 = vadd.f32 %v1561_v17, %v183_v53 }
  0xc0   :  { %v222_v57 = vmax.f32 %v196_v54, 0.0  ;;  %519 = vmatpush.bf16.msrb.mxu2 %v1366_v28 }
  0xc1   :  { %v1437_v58 = vpack.c.bf16 %v226_v56, %v225_v55  ;;  %v217_v63 = vmax.f32 %v184_v60, 0.0 }
  0xc2   :  { %v1427_v59 = vpack.c.bf16 %v222_v57, %v221_v52 }
  0xc3   :  { %1529 = vst [vmem:[#allocation2 + $0x28] sm:$0xff] %v1437_v58   ;;  %v1562_v58 = vld [vmem:[%s1778_s6] ss:$0 sm:$0xff] }
  0xc4   :  { %v208_v61 = vpop.f32.mrf.mxu3  ;;  %1527 = vst [vmem:[#allocation2 + $0x8] sm:$0xff] %v1427_v59   ;;  %v1357_v15 = vld [vmem:[#allocation2] sm:$0xff]  ;;  %520 = vmatpush.bf16.msrb.mxu2 %v1365_v30 }
  0xc5   :  { %v209_v2 = vadd.f32 %v1561_v17, %v208_v61 }
  0xc6   :  { %v185_v62 = vpop.f32.mrf.mxu0 }
  0xc7   :  { %v186_v0 = vadd.f32 %v1561_v17, %v185_v62  ;;  %v227_v6 = vmax.f32 %v209_v2, 0.0 }
  0xc8   :  { %521 = vmatpush.bf16.msrb.mxu2 %v1364_v31 }
  0xc9   :  { %v218_v1 = vmax.f32 %v186_v0, 0.0 }
  0xca   :  { %v1362_v10 = vld [vmem:[#allocation2 + $0x28] sm:$0xff] }
  0xcb   :  { %v1417_v3 = vpack.c.bf16 %v218_v1, %v217_v63  ;;  %v1360_v12 = vld [vmem:[#allocation2 + $0x8] sm:$0xff] }
  0xcc   :  { %v210_v4 = vpop.f32.mrf.mxu3 }
  0xcd   :  { %v211_v5 = vadd.f32 %v1561_v17, %v210_v4  ;;  %1525 = vst [vmem:[#allocation2 + $0x18] sm:$0xff] %v1417_v3   ;;  %v1348_v17 = vld [vmem:[%s1776_s1] sm:$0xff] }
  0xcf   :  { %v228_v7 = vmax.f32 %v211_v5, 0.0 }
  0xd1   :  { %v1442_v8 = vpack.c.bf16 %v228_v7, %v227_v6 }
  0xd3   :  { %1530 = vst [vmem:[#allocation2 + $0x38] sm:$0xff] %v1442_v8  }
  0xd4   :  { %v1358_v14 = vld [vmem:[#allocation2 + $0x18] sm:$0xff] }
  0xda   :  { %v1363_v9 = vld [vmem:[#allocation2 + $0x38] sm:$0xff] }
  0xdb   :  { %389 = vmatpush.bf16.msra.mxu1 %v1363_v9 }
  0xdf   :  { %390 = vmatpush.bf16.msra.mxu1 %v1362_v10 }
  0xe3   :  { %391 = vmatpush.bf16.msra.mxu1 %v1361_v11 }
  0xe7   :  { %392 = vmatpush.bf16.msra.mxu1 %v1360_v12 }
  0xeb   :  { %393 = vmatpush.bf16.msra.mxu1 %v1359_v13 }
  0xef   :  { %394 = vmatpush.bf16.msra.mxu1 %v1358_v14 }
  0xf3   :  { %395 = vmatpush.bf16.msra.mxu1 %v1357_v15 }
  0xf7   :  { %396 = vmatpush.bf16.msra.mxu1 %v1356_v16 }
  0xfa   :  { %397 = vmatmul.bf16.vlgmr.msra.gmra.mxu1 %v1348_v17 }
 0x10a   :  { %402 = vmatmul.bf16.gmra.mxu1 %v1349_v18 }
 0x11a   :  { %407 = vmatmul.bf16.gmra.mxu1 %v1350_v19 }
 0x12a   :  { %412 = vmatmul.bf16.gmra.mxu1 %v1351_v20 }
 0x13a   :  { %417 = vmatmul.bf16.gmra.mxu1 %v1352_v21 }
 0x14a   :  { %422 = vmatmul.bf16.gmra.mxu1 %v1353_v24 }
 0x15a   :  { %427 = vmatmul.bf16.gmra.mxu1 %v1354_v29 }
 0x16a   :  { %432 = vmatmul.bf16.gmra.mxu1 %v1355_v32 }
 0x177   :  { %v398_v33 = vpop.f32.mrf.mxu1 }
 0x17f   :  { %v400_v34 = vpop.f32.mrf.mxu1 }
 0x180   :  { %v438_v35 = vpack.c.bf16 %v400_v34, %v398_v33 }
 0x182   :  { %522 = vmatmul.bf16.vlgmr.msrb.gmra.mxu2 %v438_v35 }
 0x187   :  { %v403_v36 = vpop.f32.mrf.mxu1 }
 0x18f   :  { %v405_v37 = vpop.f32.mrf.mxu1 }
 0x190   :  { %v439_v38 = vpack.c.bf16 %v405_v37, %v403_v36 }
 0x192   :  { %527 = vmatmul.bf16.gmra.mxu2 %v439_v38 }
 0x197   :  { %v408_v39 = vpop.f32.mrf.mxu1 }
 0x19f   :  { %v410_v40 = vpop.f32.mrf.mxu1 }
 0x1a0   :  { %v440_v41 = vpack.c.bf16 %v410_v40, %v408_v39 }
 0x1a2   :  { %532 = vmatmul.bf16.gmra.mxu2 %v440_v41 }
 0x1a7   :  { %v413_v42 = vpop.f32.mrf.mxu1 }
 0x1af   :  { %v415_v43 = vpop.f32.mrf.mxu1 }
 0x1b0   :  { %v441_v44 = vpack.c.bf16 %v415_v43, %v413_v42 }
 0x1b2   :  { %537 = vmatmul.bf16.gmra.mxu2 %v441_v44 }
 0x1b7   :  { %v418_v45 = vpop.f32.mrf.mxu1 }
 0x1bf   :  { %v420_v46 = vpop.f32.mrf.mxu1 }
 0x1c0   :  { %v442_v47 = vpack.c.bf16 %v420_v46, %v418_v45 }
 0x1c2   :  { %542 = vmatmul.bf16.gmra.mxu2 %v442_v47 }
 0x1c7   :  { %v423_v48 = vpop.f32.mrf.mxu1 }
 0x1cf   :  { %v425_v49 = vpop.f32.mrf.mxu1 }
 0x1d0   :  { %v443_v50 = vpack.c.bf16 %v425_v49, %v423_v48 }
 0x1d2   :  { %547 = vmatmul.bf16.gmra.mxu2 %v443_v50 }
 0x1d7   :  { %v428_v51 = vpop.f32.mrf.mxu1 }
 0x1df   :  { %v430_v52 = vpop.f32.mrf.mxu1 }
 0x1e0   :  { %v444_v53 = vpack.c.bf16 %v430_v52, %v428_v51 }
 0x1e2   :  { %552 = vmatmul.bf16.gmra.mxu2 %v444_v53 }
 0x1e7   :  { %v433_v54 = vpop.f32.mrf.mxu1 }
 0x1ef   :  { %v435_v55 = vpop.f32.mrf.mxu1 }
 0x1f0   :  { %v445_v56 = vpack.c.bf16 %v435_v55, %v433_v54 }
 0x1f2   :  { %557 = vmatmul.bf16.gmra.mxu2 %v445_v56 }
 0x205   :  { %v523_v57 = vpop.f32.mrf.mxu2 }
 0x206   :  { %v524_v59 = vadd.f32 %v1562_v58, %v523_v57 }
 0x208   :  { %v563_v62 = vmax.f32 %v524_v59, 0.0  ;;  %v1373_v59 = vld [vmem:[%s1776_s1 + $0x8] sm:$0xff] }
 0x20d   :  { %v525_v60 = vpop.f32.mrf.mxu2 }
 0x20e   :  { %v526_v61 = vadd.f32 %v1562_v58, %v525_v60  ;;  %v1374_v60 = vld [vmem:[%s1776_s1 + $0x10] sm:$0xff] }
 0x210   :  { %v564_v63 = vmax.f32 %v526_v61, 0.0  ;;  %v1375_v61 = vld [vmem:[%s1776_s1 + $0x18] sm:$0xff] }
 0x212   :  { %v1447_v0 = vpack.c.bf16 %v564_v63, %v563_v62  ;;  %v1376_v62 = vld [vmem:[%s1776_s1 + $0x20] sm:$0xff]  ;;  %v1395_v63 = vld [vmem:[%s1779_s7 + $0x38] sm:$0xff] }
 0x213   :  { %864 = vmatpush.bf16.msrb.mxu0 %v1395_v63 }
 0x214   :  { %1448 = vst [vmem:[#allocation2 + $0x30] sm:$0xff] %v1447_v0   ;;  %v1377_v0 = vld [vmem:[%s1776_s1 + $0x28] sm:$0xff] }
 0x215   :  { %v528_v1 = vpop.f32.mrf.mxu2 }
 0x216   :  { %v529_v2 = vadd.f32 %v1562_v58, %v528_v1  ;;  %v1394_v1 = vld [vmem:[%s1779_s7 + $0x30] sm:$0xff] }
 0x217   :  { %865 = vmatpush.bf16.msrb.mxu0 %v1394_v1 }
 0x218   :  { %v565_v5 = vmax.f32 %v529_v2, 0.0  ;;  %v1393_v2 = vld [vmem:[%s1779_s7 + $0x28] sm:$0xff] }
 0x21b   :  { %v1380_v57 = vld [vmem:[#allocation2 + $0x30] sm:$0xff]  ;;  %866 = vmatpush.bf16.msrb.mxu0 %v1393_v2 }
 0x21d   :  { %v530_v3 = vpop.f32.mrf.mxu2 }
 0x21e   :  { %v531_v4 = vadd.f32 %v1562_v58, %v530_v3  ;;  %v1392_v3 = vld [vmem:[%s1779_s7 + $0x20] sm:$0xff] }
 0x21f   :  { %867 = vmatpush.bf16.msrb.mxu0 %v1392_v3 }
 0x220   :  { %v566_v6 = vmax.f32 %v531_v4, 0.0  ;;  %v1391_v4 = vld [vmem:[%s1779_s7 + $0x18] sm:$0xff] }
 0x222   :  { %v1452_v7 = vpack.c.bf16 %v566_v6, %v565_v5  ;;  %v1378_v5 = vld [vmem:[%s1776_s1 + $0x30] sm:$0xff] }
 0x223   :  { %868 = vmatpush.bf16.msrb.mxu0 %v1391_v4  ;;  %v1390_v6 = vld [vmem:[%s1779_s7 + $0x10] sm:$0xff] }
 0x224   :  { %1531 = vst [vmem:[#allocation2] sm:$0xff] %v1452_v7   ;;  %v1389_v7 = vld [vmem:[%s1779_s7 + $0x8] sm:$0xff] }
 0x225   :  { %v533_v8 = vpop.f32.mrf.mxu2 }
 0x226   :  { %v534_v9 = vadd.f32 %v1562_v58, %v533_v8  ;;  %v1388_v8 = vld [vmem:[%s1779_s7] sm:$0xff] }
 0x227   :  { %869 = vmatpush.bf16.msrb.mxu0 %v1390_v6 }
 0x228   :  { %v567_v12 = vmax.f32 %v534_v9, 0.0  ;;  %v1379_v9 = vld [vmem:[%s1776_s1 + $0x38] sm:$0xff] }
 0x22b   :  { %v1381_v56 = vld [vmem:[#allocation2] sm:$0xff]  ;;  %870 = vmatpush.bf16.msrb.mxu0 %v1389_v7 }
 0x22d   :  { %v535_v10 = vpop.f32.mrf.mxu2 }
 0x22e   :  { %v536_v11 = vadd.f32 %v1562_v58, %v535_v10 }
 0x22f   :  { %871 = vmatpush.bf16.msrb.mxu0 %v1388_v8 }
 0x230   :  { %v568_v13 = vmax.f32 %v536_v11, 0.0 }
 0x232   :  { %v1457_v14 = vpack.c.bf16 %v568_v13, %v567_v12 }
 0x234   :  { %1532 = vst [vmem:[#allocation2 + $0x18] sm:$0xff] %v1457_v14  }
 0x235   :  { %v538_v15 = vpop.f32.mrf.mxu2 }
 0x236   :  { %v539_v16 = vadd.f32 %v1562_v58, %v538_v15 }
 0x238   :  { %v569_v19 = vmax.f32 %v539_v16, 0.0 }
 0x23b   :  { %v1382_v55 = vld [vmem:[#allocation2 + $0x18] sm:$0xff] }
 0x23d   :  { %v540_v17 = vpop.f32.mrf.mxu2 }
 0x23e   :  { %v541_v18 = vadd.f32 %v1562_v58, %v540_v17 }
 0x240   :  { %v570_v20 = vmax.f32 %v541_v18, 0.0 }
 0x242   :  { %v1462_v21 = vpack.c.bf16 %v570_v20, %v569_v19 }
 0x244   :  { %1533 = vst [vmem:[#allocation2 + $0x10] sm:$0xff] %v1462_v21  }
 0x245   :  { %v543_v22 = vpop.f32.mrf.mxu2 }
 0x246   :  { %v544_v23 = vadd.f32 %v1562_v58, %v543_v22 }
 0x248   :  { %v571_v26 = vmax.f32 %v544_v23, 0.0 }
 0x24b   :  { %v1383_v54 = vld [vmem:[#allocation2 + $0x10] sm:$0xff] }
 0x24d   :  { %v545_v24 = vpop.f32.mrf.mxu2 }
 0x24e   :  { %v546_v25 = vadd.f32 %v1562_v58, %v545_v24 }
 0x250   :  { %v572_v27 = vmax.f32 %v546_v25, 0.0 }
 0x252   :  { %v1467_v28 = vpack.c.bf16 %v572_v27, %v571_v26 }
 0x254   :  { %1534 = vst [vmem:[#allocation2 + $0x8] sm:$0xff] %v1467_v28  }
 0x255   :  { %v548_v29 = vpop.f32.mrf.mxu2 }
 0x256   :  { %v549_v30 = vadd.f32 %v1562_v58, %v548_v29 }
 0x258   :  { %v573_v33 = vmax.f32 %v549_v30, 0.0 }
 0x25b   :  { %v1384_v53 = vld [vmem:[#allocation2 + $0x8] sm:$0xff] }
 0x25d   :  { %v550_v31 = vpop.f32.mrf.mxu2 }
 0x25e   :  { %v551_v32 = vadd.f32 %v1562_v58, %v550_v31 }
 0x260   :  { %v574_v34 = vmax.f32 %v551_v32, 0.0 }
 0x262   :  { %v1472_v35 = vpack.c.bf16 %v574_v34, %v573_v33 }
 0x264   :  { %1535 = vst [vmem:[#allocation2 + $0x20] sm:$0xff] %v1472_v35   ;;  %v1563_v35 = vld [vmem:[%s1780_s8] ss:$0 sm:$0xff] }
 0x265   :  { %v553_v36 = vpop.f32.mrf.mxu2 }
 0x266   :  { %v554_v37 = vadd.f32 %v1562_v58, %v553_v36 }
 0x268   :  { %v575_v40 = vmax.f32 %v554_v37, 0.0 }
 0x26b   :  { %v1385_v52 = vld [vmem:[#allocation2 + $0x20] sm:$0xff] }
 0x26d   :  { %v555_v38 = vpop.f32.mrf.mxu2 }
 0x26e   :  { %v556_v39 = vadd.f32 %v1562_v58, %v555_v38 }
 0x270   :  { %v576_v41 = vmax.f32 %v556_v39, 0.0 }
 0x272   :  { %v1477_v42 = vpack.c.bf16 %v576_v41, %v575_v40 }
 0x274   :  { %1536 = vst [vmem:[#allocation2 + $0x28] sm:$0xff] %v1477_v42  }
 0x275   :  { %v558_v43 = vpop.f32.mrf.mxu2 }
 0x276   :  { %v559_v44 = vadd.f32 %v1562_v58, %v558_v43 }
 0x278   :  { %v577_v47 = vmax.f32 %v559_v44, 0.0 }
 0x27b   :  { %v1386_v51 = vld [vmem:[#allocation2 + $0x28] sm:$0xff] }
 0x27d   :  { %v560_v45 = vpop.f32.mrf.mxu2 }
 0x27e   :  { %v561_v46 = vadd.f32 %v1562_v58, %v560_v45  ;;  %v1372_v58 = vld [vmem:[%s1776_s1] sm:$0xff] }
 0x280   :  { %v578_v48 = vmax.f32 %v561_v46, 0.0 }
 0x282   :  { %v1482_v49 = vpack.c.bf16 %v578_v48, %v577_v47 }
 0x284   :  { %1537 = vst [vmem:[#allocation2 + $0x38] sm:$0xff] %v1482_v49  }
 0x28b   :  { %v1387_v50 = vld [vmem:[#allocation2 + $0x38] sm:$0xff] }
 0x28c   :  { %739 = vmatpush.bf16.msrb.mxu3 %v1387_v50 }
 0x290   :  { %740 = vmatpush.bf16.msrb.mxu3 %v1386_v51 }
 0x294   :  { %741 = vmatpush.bf16.msrb.mxu3 %v1385_v52 }
 0x298   :  { %742 = vmatpush.bf16.msrb.mxu3 %v1384_v53 }
 0x29c   :  { %743 = vmatpush.bf16.msrb.mxu3 %v1383_v54 }
 0x2a0   :  { %744 = vmatpush.bf16.msrb.mxu3 %v1382_v55 }
 0x2a4   :  { %745 = vmatpush.bf16.msrb.mxu3 %v1381_v56 }
 0x2a8   :  { %746 = vmatpush.bf16.msrb.mxu3 %v1380_v57 }
 0x2ab   :  { %747 = vmatmul.bf16.vlgmr.msrb.gmra.mxu3 %v1372_v58 }
 0x2bb   :  { %752 = vmatmul.bf16.gmra.mxu3 %v1373_v59 }
 0x2cb   :  { %757 = vmatmul.bf16.gmra.mxu3 %v1374_v60 }
 0x2db   :  { %762 = vmatmul.bf16.gmra.mxu3 %v1375_v61 }
 0x2eb   :  { %767 = vmatmul.bf16.gmra.mxu3 %v1376_v62 }
 0x2fb   :  { %772 = vmatmul.bf16.gmra.mxu3 %v1377_v0 }
 0x30b   :  { %777 = vmatmul.bf16.gmra.mxu3 %v1378_v5 }
 0x31b   :  { %782 = vmatmul.bf16.gmra.mxu3 %v1379_v9 }
 0x32e   :  { %v748_v10 = vpop.f32.mrf.mxu3 }
 0x336   :  { %v750_v11 = vpop.f32.mrf.mxu3 }
 0x337   :  { %v788_v12 = vpack.c.bf16 %v750_v11, %v748_v10 }
 0x339   :  { %872 = vmatmul.bf16.vlgmr.msrb.gmra.mxu0 %v788_v12 }
 0x33e   :  { %v753_v13 = vpop.f32.mrf.mxu3 }
 0x346   :  { %v755_v14 = vpop.f32.mrf.mxu3 }
 0x347   :  { %v789_v15 = vpack.c.bf16 %v755_v14, %v753_v13 }
 0x349   :  { %877 = vmatmul.bf16.gmra.mxu0 %v789_v15 }
 0x34e   :  { %v758_v16 = vpop.f32.mrf.mxu3 }
 0x356   :  { %v760_v17 = vpop.f32.mrf.mxu3 }
 0x357   :  { %v790_v18 = vpack.c.bf16 %v760_v17, %v758_v16 }
 0x359   :  { %882 = vmatmul.bf16.gmra.mxu0 %v790_v18 }
 0x35e   :  { %v763_v19 = vpop.f32.mrf.mxu3 }
 0x366   :  { %v765_v20 = vpop.f32.mrf.mxu3 }
 0x367   :  { %v791_v21 = vpack.c.bf16 %v765_v20, %v763_v19 }
 0x369   :  { %887 = vmatmul.bf16.gmra.mxu0 %v791_v21 }
 0x36e   :  { %v768_v22 = vpop.f32.mrf.mxu3 }
 0x376   :  { %v770_v23 = vpop.f32.mrf.mxu3 }
 0x377   :  { %v792_v24 = vpack.c.bf16 %v770_v23, %v768_v22 }
 0x379   :  { %892 = vmatmul.bf16.gmra.mxu0 %v792_v24 }
 0x37e   :  { %v773_v25 = vpop.f32.mrf.mxu3 }
 0x386   :  { %v775_v26 = vpop.f32.mrf.mxu3 }
 0x387   :  { %v793_v27 = vpack.c.bf16 %v775_v26, %v773_v25 }
 0x389   :  { %897 = vmatmul.bf16.gmra.mxu0 %v793_v27 }
 0x38e   :  { %v778_v28 = vpop.f32.mrf.mxu3 }
 0x396   :  { %v780_v29 = vpop.f32.mrf.mxu3 }
 0x397   :  { %v794_v30 = vpack.c.bf16 %v780_v29, %v778_v28 }
 0x399   :  { %902 = vmatmul.bf16.gmra.mxu0 %v794_v30 }
 0x39e   :  { %v783_v31 = vpop.f32.mrf.mxu3 }
 0x3a6   :  { %v785_v32 = vpop.f32.mrf.mxu3 }
 0x3a7   :  { %v795_v33 = vpack.c.bf16 %v785_v32, %v783_v31 }
 0x3a9   :  { %907 = vmatmul.bf16.gmra.mxu0 %v795_v33 }
 0x3b6   :  { %v873_v34 = vpop.f32.mrf.mxu0 }
 0x3b7   :  { %v874_v36 = vadd.f32 %v1563_v35, %v873_v34 }
 0x3b9   :  { %v913_v39 = vmax.f32 %v874_v36, 0.0 }
 0x3be   :  { %v875_v37 = vpop.f32.mrf.mxu0 }
 0x3bf   :  { %v876_v38 = vadd.f32 %v1563_v35, %v875_v37 }
 0x3c1   :  { %v914_v40 = vmax.f32 %v876_v38, 0.0 }
 0x3c3   :  { %v1487_v41 = vpack.c.bf16 %v914_v40, %v913_v39 }
 0x3c5   :  { %1488 = vst [vmem:[#allocation2 + $0x30] sm:$0xff] %v1487_v41  }
 0x3c6   :  { %v878_v42 = vpop.f32.mrf.mxu0 }
 0x3c7   :  { %v879_v43 = vadd.f32 %v1563_v35, %v878_v42 }
 0x3c9   :  { %v915_v46 = vmax.f32 %v879_v43, 0.0 }
 0x3cc   :  { %v1396_v34 = vld [vmem:[#allocation2 + $0x30] sm:$0xff] }
 0x3ce   :  { %v880_v44 = vpop.f32.mrf.mxu0 }
 0x3cf   :  { %v881_v45 = vadd.f32 %v1563_v35, %v880_v44 }
 0x3d1   :  { %v916_v47 = vmax.f32 %v881_v45, 0.0 }
 0x3d3   :  { %v1492_v48 = vpack.c.bf16 %v916_v47, %v915_v46 }
 0x3d5   :  { %1538 = vst [vmem:[#allocation2] sm:$0xff] %v1492_v48  }
 0x3d6   :  { %v883_v49 = vpop.f32.mrf.mxu0 }
 0x3d7   :  { %v884_v50 = vadd.f32 %v1563_v35, %v883_v49 }
 0x3d9   :  { %v917_v53 = vmax.f32 %v884_v50, 0.0 }
 0x3dc   :  { %v1397_v33 = vld [vmem:[#allocation2] sm:$0xff] }
 0x3de   :  { %v885_v51 = vpop.f32.mrf.mxu0 }
 0x3df   :  { %v886_v52 = vadd.f32 %v1563_v35, %v885_v51 }
 0x3e1   :  { %v918_v54 = vmax.f32 %v886_v52, 0.0 }
 0x3e3   :  { %v1497_v55 = vpack.c.bf16 %v918_v54, %v917_v53 }
 0x3e5   :  { %1539 = vst [vmem:[#allocation2 + $0x18] sm:$0xff] %v1497_v55  }
 0x3e6   :  { %v888_v56 = vpop.f32.mrf.mxu0 }
 0x3e7   :  { %v889_v57 = vadd.f32 %v1563_v35, %v888_v56 }
 0x3e9   :  { %v919_v60 = vmax.f32 %v889_v57, 0.0 }
 0x3ec   :  { %v1398_v32 = vld [vmem:[#allocation2 + $0x18] sm:$0xff] }
 0x3ee   :  { %v890_v58 = vpop.f32.mrf.mxu0 }
 0x3ef   :  { %v891_v59 = vadd.f32 %v1563_v35, %v890_v58 }
 0x3f1   :  { %v920_v61 = vmax.f32 %v891_v59, 0.0 }
 0x3f3   :  { %v1502_v62 = vpack.c.bf16 %v920_v61, %v919_v60 }
 0x3f5   :  { %1540 = vst [vmem:[#allocation2 + $0x10] sm:$0xff] %v1502_v62  }
 0x3f6   :  { %v893_v63 = vpop.f32.mrf.mxu0 }
 0x3f7   :  { %v894_v0 = vadd.f32 %v1563_v35, %v893_v63 }
 0x3f9   :  { %v921_v3 = vmax.f32 %v894_v0, 0.0 }
 0x3fc   :  { %v1399_v31 = vld [vmem:[#allocation2 + $0x10] sm:$0xff] }
 0x3fe   :  { %v895_v1 = vpop.f32.mrf.mxu0 }
 0x3ff   :  { %v896_v2 = vadd.f32 %v1563_v35, %v895_v1 }
 0x401   :  { %v922_v4 = vmax.f32 %v896_v2, 0.0 }
 0x403   :  { %v1507_v5 = vpack.c.bf16 %v922_v4, %v921_v3 }
 0x405   :  { %1541 = vst [vmem:[#allocation2 + $0x8] sm:$0xff] %v1507_v5  }
 0x406   :  { %v898_v6 = vpop.f32.mrf.mxu0 }
 0x407   :  { %v899_v7 = vadd.f32 %v1563_v35, %v898_v6 }
 0x409   :  { %v923_v10 = vmax.f32 %v899_v7, 0.0 }
 0x40c   :  { %v1400_v30 = vld [vmem:[#allocation2 + $0x8] sm:$0xff] }
 0x40e   :  { %v900_v8 = vpop.f32.mrf.mxu0 }
 0x40f   :  { %v901_v9 = vadd.f32 %v1563_v35, %v900_v8 }
 0x411   :  { %v924_v11 = vmax.f32 %v901_v9, 0.0 }
 0x413   :  { %v1512_v12 = vpack.c.bf16 %v924_v11, %v923_v10 }
 0x415   :  { %1542 = vst [vmem:[#allocation2 + $0x20] sm:$0xff] %v1512_v12  }
 0x416   :  { %v903_v13 = vpop.f32.mrf.mxu0 }
 0x417   :  { %v904_v14 = vadd.f32 %v1563_v35, %v903_v13 }
 0x419   :  { %v925_v17 = vmax.f32 %v904_v14, 0.0 }
 0x41c   :  { %v1401_v29 = vld [vmem:[#allocation2 + $0x20] sm:$0xff] }
 0x41e   :  { %v905_v15 = vpop.f32.mrf.mxu0 }
 0x41f   :  { %v906_v16 = vadd.f32 %v1563_v35, %v905_v15 }
 0x421   :  { %v926_v18 = vmax.f32 %v906_v16, 0.0 }
 0x423   :  { %v1517_v19 = vpack.c.bf16 %v926_v18, %v925_v17 }
 0x425   :  { %1543 = vst [vmem:[#allocation2 + $0x28] sm:$0xff] %v1517_v19  }
 0x426   :  { %v908_v20 = vpop.f32.mrf.mxu0 }
 0x427   :  { %v909_v21 = vadd.f32 %v1563_v35, %v908_v20 }
 0x429   :  { %v927_v24 = vmax.f32 %v909_v21, 0.0 }
 0x42c   :  { %v1402_v28 = vld [vmem:[#allocation2 + $0x28] sm:$0xff] }
 0x42e   :  { %v910_v22 = vpop.f32.mrf.mxu0 }
 0x42f   :  { %v911_v23 = vadd.f32 %v1563_v35, %v910_v22  ;;  %v961_v35 = vld [vmem:[%s1781_s2] sm:$0xf] }
 0x431   :  { %v928_v25 = vmax.f32 %v911_v23, 0.0 }
 0x433   :  { %v1522_v26 = vpack.c.bf16 %v928_v25, %v927_v24 }
 0x435   :  { %1544 = vst [vmem:[#allocation2 + $0x38] sm:$0xff] %v1522_v26  }
 0x43c   :  { %v1403_v27 = vld [vmem:[#allocation2 + $0x38] sm:$0xff] }
 0x43d   :  { %1026 = vmatpush.bf16.msrb.mxu1 %v1403_v27 }
 0x441   :  { %1027 = vmatpush.bf16.msrb.mxu1 %v1402_v28 }
 0x445   :  { %1028 = vmatpush.bf16.msrb.mxu1 %v1401_v29 }
 0x449   :  { %1029 = vmatpush.bf16.msrb.mxu1 %v1400_v30 }
 0x44d   :  { %1030 = vmatpush.bf16.msrb.mxu1 %v1399_v31 }
 0x451   :  { %1031 = vmatpush.bf16.msrb.mxu1 %v1398_v32 }
 0x455   :  { %1032 = vmatpush.bf16.msrb.mxu1 %v1397_v33 }
 0x459   :  { %1033 = vmatpush.bf16.msrb.mxu1 %v1396_v34 }
 0x45c   :  { %1034 = vmatmul.bf16.vlgmr.msrb.gmra.mxu1 %v961_v35 }
 0x4d9   :  { %v1035_v36 = vpop.f32.mrf.mxu1 }
 0x4da   :  { %1039 = vst [vmem:[%s1782_s9] sm:$0xff] %v1035_v36 }
 0x4e1   :  { %v1037_v37 = vpop.f32.mrf.mxu1 }

</bundles_post_ra>
